<compile_context>
chip_gen: v6e
topology: v6e:2x2x1
jax: 0.10.0
libtpu: 0.0.40
codegen_flags: <defaults>
</compile_context>

<pallas_src>
import functools

import numpy as np
import jax
import jax.numpy as jnp
from jax.experimental import pallas as pl
from jax.experimental.pallas import tpu as pltpu

# ---- model hyperparameters (small, consistent with the module) -------------
B = 2          # batch
T = 8          # block_size (sequence length)
N_EMBD = 32    # n_embd
N_HEAD = 4     # n_head
HEAD_SIZE = N_EMBD // N_HEAD
FF_HIDDEN = 4 * N_EMBD
LN_EPS = 1e-5
NEG_INF = -1e30


# ---------------------------------------------------------------------------
# Pallas kernel: full transformer block, whole (B*T, C) problem in one shot.
# ---------------------------------------------------------------------------
def block_kernel(x_ref, bias_ref,
                 wqkv_ref, bqkv_ref, wp_ref, bp_ref,
                 w1_ref, b1_ref, w2_ref, b2_ref,
                 o_ref, *, n_head):
    bt, c = x_ref.shape                      # (B*T, C)
    d = c // n_head

    x = x_ref[...].astype(jnp.float32)

    # ---------------- LayerNorm 1 (affine folded into wqkv/bqkv) -----------
    mu = jnp.mean(x, axis=-1, keepdims=True)
    var = jnp.mean((x - mu) ** 2, axis=-1, keepdims=True)
    xn1 = (x - mu) * jax.lax.rsqrt(var + LN_EPS)

    # ---------------- fused QKV projection (one matmul) --------------------
    # attention scale and LN1 gamma/beta are pre-folded into wqkv/bqkv
    qkv = jnp.dot(xn1, wqkv_ref[...],
                  preferred_element_type=jnp.float32) + bqkv_ref[...]   # (BT, 3C)
    q = qkv[:, :c]
    k = qkv[:, c:2 * c]
    v = qkv[:, 2 * c:]

    # head-major stacks (H, BT, D): single reshape + transpose per tensor
    q3 = jnp.transpose(q.reshape(bt, n_head, d), (1, 0, 2))
    k3 = jnp.transpose(k.reshape(bt, n_head, d), (1, 0, 2))
    v3 = jnp.transpose(v.reshape(bt, n_head, d), (1, 0, 2))

    # ---------------- batched causal self-attention (all heads at once) ----
    scores = jnp.einsum('hqd,hkd->hqk', q3, k3,
                        preferred_element_type=jnp.float32)             # (H, BT, BT)
    # precomputed additive block-diagonal causal bias (0 / -1e30)
    scores = scores + bias_ref[...][None, :, :]

    m = jnp.max(scores, axis=-1, keepdims=True)
    p = jnp.exp(scores - m)
    denom = jnp.sum(p, axis=-1, keepdims=True)
    wei = p / denom                                                      # exact softmax

    att = jnp.einsum('hqk,hkd->hqd', wei, v3,
                     preferred_element_type=jnp.float32)                 # (H, BT, D)

    # flatten heads back to (BT, C): head reduction happens inside ONE matmul
    att2 = jnp.transpose(att, (1, 0, 2)).reshape(bt, c)
    sa = jnp.dot(att2, wp_ref[...],
                 preferred_element_type=jnp.float32) + bp_ref[...]
    x1 = x + sa                                                          # residual 1

    # ---------------- LayerNorm 2 (affine folded into w1/b1) ---------------
    mu2 = jnp.mean(x1, axis=-1, keepdims=True)
    var2 = jnp.mean((x1 - mu2) ** 2, axis=-1, keepdims=True)
    xn2 = (x1 - mu2) * jax.lax.rsqrt(var2 + LN_EPS)

    # ---------------- feed-forward ------------------------------------------
    hdn = jnp.dot(xn2, w1_ref[...],
                  preferred_element_type=jnp.float32) + b1_ref[...]
    hdn = jnp.maximum(hdn, 0.0)                                          # ReLU
    ff = jnp.dot(hdn, w2_ref[...],
                 preferred_element_type=jnp.float32) + b2_ref[...]

    o_ref[...] = (x1 + ff).astype(o_ref.dtype)                           # residual 2


# ---------------------------------------------------------------------------
# One-time (outside jit) parameter folding: LN affines + attention scale
# are absorbed into the downstream projection weights/biases.
# ---------------------------------------------------------------------------
def fold_params(params):
    (ln1_g, ln1_b, wq, wk, wv, wp, bp, ln2_g, ln2_b, w1, b1, w2, b2) = params
    c = wq.shape[0]
    d = c // N_HEAD
    scale = d ** -0.5

    g1 = ln1_g.reshape(-1)
    bb1 = ln1_b.reshape(-1)
    g2 = ln2_g.reshape(-1)
    bb2 = ln2_b.reshape(-1)

    wqkv_s = jnp.concatenate([wq * scale, wk, wv], axis=1)       # (C, 3C), scale in Wq
    wqkv_f = g1[:, None] * wqkv_s                                 # fold LN1 gamma
    bqkv_f = (bb1 @ wqkv_s).reshape(1, 3 * c)                     # fold LN1 beta

    w1_f = g2[:, None] * w1                                       # fold LN2 gamma
    b1_f = (bb2 @ w1 + b1.reshape(-1)).reshape(1, -1)             # fold LN2 beta

    return (wqkv_f, bqkv_f, wp, bp.reshape(1, c),
            w1_f, b1_f, w2, b2.reshape(1, c))


def build_attention_bias(batch, seq_len):
    """Trace-time constant: block-diagonal causal additive bias (BT, BT)."""
    bt = batch * seq_len
    r = np.arange(bt)
    same_batch = (r[:, None] // seq_len) == (r[None, :] // seq_len)
    causal = r[:, None] >= r[None, :]
    bias = np.where(same_batch & causal, 0.0, NEG_INF).astype(np.float32)
    return jnp.asarray(bias)


# ---------------------------------------------------------------------------
# Wrapper: one kernel invocation, everything resident in VMEM (~50 KB).
# ---------------------------------------------------------------------------
@jax.jit
def _block_call(x2d, bias, wqkv, bqkv, wp, bp, w1, b1, w2, b2):
    bt, c = x2d.shape
    kernel = functools.partial(block_kernel, n_head=N_HEAD)
    vmem = lambda: pl.BlockSpec(memory_space=pltpu.MemorySpace.VMEM)
    return pl.pallas_call(
        kernel,
        out_shape=jax.ShapeDtypeStruct((bt, c), x2d.dtype),
        in_specs=[vmem() for _ in range(10)],
        out_specs=vmem(),
    )(x2d, bias, wqkv, bqkv, wp, bp, w1, b1, w2, b2)


def transformer_block(x, folded_params, bias):
    Bn, Tn, Cn = x.shape
    out2d = _block_call(x.reshape(Bn * Tn, Cn), bias, *folded_params)
    return out2d.reshape(Bn, Tn, Cn)


# ---------------------------------------------------------------------------
# Pure-JAX reference (for correctness check)
# ---------------------------------------------------------------------------
def ref_block(x, params):
    (ln1_g, ln1_b, wq, wk, wv, wp, bp, ln2_g, ln2_b, w1, b1, w2, b2) = params

    def layernorm(z, g, b):
        mu = jnp.mean(z, axis=-1, keepdims=True)
        var = jnp.mean((z - mu) ** 2, axis=-1, keepdims=True)
        return (z - mu) * jax.lax.rsqrt(var + LN_EPS) * g + b

    xn1 = layernorm(x, ln1_g, ln1_b)
    q = xn1 @ wq
    k = xn1 @ wk
    v = xn1 @ wv
    q = q.reshape(B, T, N_HEAD, HEAD_SIZE).transpose(0, 2, 1, 3)
    k = k.reshape(B, T, N_HEAD, HEAD_SIZE).transpose(0, 2, 1, 3)
    v = v.reshape(B, T, N_HEAD, HEAD_SIZE).transpose(0, 2, 1, 3)
    scores = jnp.einsum("bhqd,bhkd->bhqk", q, k) * HEAD_SIZE ** (-0.5)
    mask = jnp.tril(jnp.ones((T, T), bool))
    scores = jnp.where(mask, scores, NEG_INF)
    wei = jax.nn.softmax(scores, axis=-1)
    out = jnp.einsum("bhqk,bhkd->bhqd", wei, v)
    out = out.transpose(0, 2, 1, 3).reshape(B, T, N_EMBD)
    sa = out @ wp + bp
    x1 = x + sa
    xn2 = layernorm(x1, ln2_g, ln2_b)
    ff = jnp.maximum(xn2 @ w1 + b1, 0.0) @ w2 + b2
    return x1 + ff


# ---------------------------------------------------------------------------
if __name__ == "__main__":
    key = jax.random.PRNGKey(0)
    keys = jax.random.split(key, 16)

    x = jax.random.normal(keys[0], (B, T, N_EMBD), dtype=jnp.float32)

    s = 0.1  # small init scale
    params = [
        jnp.ones((1, N_EMBD), jnp.float32),                                # ln1 gamma
        jnp.zeros((1, N_EMBD), jnp.float32),                               # ln1 beta
        s * jax.random.normal(keys[1], (N_EMBD, N_EMBD), jnp.float32),     # Wq
        s * jax.random.normal(keys[2], (N_EMBD, N_EMBD), jnp.float32),     # Wk
        s * jax.random.normal(keys[3], (N_EMBD, N_EMBD), jnp.float32),     # Wv
        s * jax.random.normal(keys[4], (N_EMBD, N_EMBD), jnp.float32),     # Wproj
        s * jax.random.normal(keys[5], (1, N_EMBD), jnp.float32),          # bproj
        jnp.ones((1, N_EMBD), jnp.float32),                                # ln2 gamma
        jnp.zeros((1, N_EMBD), jnp.float32),                               # ln2 beta
        s * jax.random.normal(keys[6], (N_EMBD, FF_HIDDEN), jnp.float32),  # W1
        s * jax.random.normal(keys[7], (1, FF_HIDDEN), jnp.float32),       # b1
        s * jax.random.normal(keys[8], (FF_HIDDEN, N_EMBD), jnp.float32),  # W2
        s * jax.random.normal(keys[9], (1, N_EMBD), jnp.float32),          # b2
    ]

    folded = fold_params(params)                     # one-time weight folding
    bias = build_attention_bias(B, T)                # trace-time constant mask

    out = transformer_block(x, folded, bias)
    out = jax.block_until_ready(out)

    ref = ref_block(x, params)
    assert out.shape == (B, T, N_EMBD)
    assert jnp.allclose(out, ref, atol=2e-4, rtol=2e-4), "mismatch vs reference"

    print("KERNEL_OK")
</pallas_src>

<mosaic_0001>
module attributes {stable_mosaic.version = 11 : i64} {
  func.func @block_kernel(%arg0: memref<16x32xf32, #tpu.memory_space<vmem>>, %arg1: memref<16x16xf32, #tpu.memory_space<vmem>>, %arg2: memref<32x96xf32, #tpu.memory_space<vmem>>, %arg3: memref<1x96xf32, #tpu.memory_space<vmem>>, %arg4: memref<32x32xf32, #tpu.memory_space<vmem>>, %arg5: memref<1x32xf32, #tpu.memory_space<vmem>>, %arg6: memref<32x128xf32, #tpu.memory_space<vmem>>, %arg7: memref<1x128xf32, #tpu.memory_space<vmem>>, %arg8: memref<128x32xf32, #tpu.memory_space<vmem>>, %arg9: memref<1x32xf32, #tpu.memory_space<vmem>>, %arg10: memref<16x32xf32, #tpu.memory_space<vmem>>) attributes {dimension_semantics = [], scalar_prefetch = 0 : i64, scratch_operands = 0 : i64, tpu.core_type = #tpu.core_type<tc>} {
    %c0 = arith.constant 0 : index
    %c0_0 = arith.constant 0 : index
    %0 = vector.load %arg0[%c0, %c0_0] : memref<16x32xf32, #tpu.memory_space<vmem>>, vector<16x32xf32>
    %cst = arith.constant dense<0.000000e+00> : vector<16xf32>
    %1 = vector.multi_reduction <add>, %0, %cst [1] : vector<16x32xf32> to vector<16xf32>
    %2 = vector.shape_cast %1 : vector<16xf32> to vector<16x1xf32>
    %cst_1 = arith.constant 3.200000e+01 : f32
    %3 = vector.broadcast %cst_1 : f32 to vector<16x1xf32>
    %4 = arith.divf %2, %3 : vector<16x1xf32>
    %5 = vector.broadcast %4 : vector<16x1xf32> to vector<16x32xf32>
    %6 = arith.subf %0, %5 : vector<16x32xf32>
    %7 = arith.mulf %6, %6 : vector<16x32xf32>
    %cst_2 = arith.constant dense<0.000000e+00> : vector<16xf32>
    %8 = vector.multi_reduction <add>, %7, %cst_2 [1] : vector<16x32xf32> to vector<16xf32>
    %9 = vector.shape_cast %8 : vector<16xf32> to vector<16x1xf32>
    %cst_3 = arith.constant 3.200000e+01 : f32
    %10 = vector.broadcast %cst_3 : f32 to vector<16x1xf32>
    %11 = arith.divf %9, %10 : vector<16x1xf32>
    %12 = vector.broadcast %4 : vector<16x1xf32> to vector<16x32xf32>
    %13 = arith.subf %0, %12 : vector<16x32xf32>
    %cst_4 = arith.constant 9.99999974E-6 : f32
    %14 = vector.broadcast %cst_4 : f32 to vector<16x1xf32>
    %15 = arith.addf %11, %14 : vector<16x1xf32>
    %16 = math.rsqrt %15 : vector<16x1xf32>
    %17 = vector.broadcast %16 : vector<16x1xf32> to vector<16x32xf32>
    %18 = arith.mulf %13, %17 : vector<16x32xf32>
    %c0_5 = arith.constant 0 : index
    %c0_6 = arith.constant 0 : index
    %19 = vector.load %arg2[%c0_5, %c0_6] : memref<32x96xf32, #tpu.memory_space<vmem>>, vector<32x96xf32>
    %cst_7 = arith.constant dense<0.000000e+00> : vector<16x96xf32>
    %20 = tpu.matmul %18, %19, %cst_7 {dimension_numbers = #tpu.dot_dimension_numbers<[1], [0], [0], [1], [0, 0, 1, 1], [], []>} : vector<16x32xf32>, vector<32x96xf32>, vector<16x96xf32> -> vector<16x96xf32>
    %c0_8 = arith.constant 0 : index
    %c0_9 = arith.constant 0 : index
    %21 = vector.load %arg3[%c0_8, %c0_9] : memref<1x96xf32, #tpu.memory_space<vmem>>, vector<1x96xf32>
    %22 = vector.broadcast %21 : vector<1x96xf32> to vector<16x96xf32>
    %23 = arith.addf %20, %22 : vector<16x96xf32>
    %24 = vector.extract_strided_slice %23 {offsets = [0, 0], sizes = [16, 32], strides = [1, 1]} : vector<16x96xf32> to vector<16x32xf32>
    %25 = vector.extract_strided_slice %23 {offsets = [0, 32], sizes = [16, 32], strides = [1, 1]} : vector<16x96xf32> to vector<16x32xf32>
    %26 = vector.extract_strided_slice %23 {offsets = [0, 64], sizes = [16, 32], strides = [1, 1]} : vector<16x96xf32> to vector<16x32xf32>
    %27 = vector.shape_cast %24 : vector<16x32xf32> to vector<16x4x8xf32>
    %28 = tpu.transpose %27, [1, 0, 2] : vector<16x4x8xf32> -> vector<4x16x8xf32>
    %29 = vector.shape_cast %25 : vector<16x32xf32> to vector<16x4x8xf32>
    %30 = tpu.transpose %29, [1, 0, 2] : vector<16x4x8xf32> -> vector<4x16x8xf32>
    %31 = vector.shape_cast %26 : vector<16x32xf32> to vector<16x4x8xf32>
    %32 = tpu.transpose %31, [1, 0, 2] : vector<16x4x8xf32> -> vector<4x16x8xf32>
    "tpu.trace_start"() <{level = 10 : i32, message = "hqd,hkd->hqk"}> : () -> ()
    %cst_10 = arith.constant dense<0.000000e+00> : vector<4x16x16xf32>
    %33 = tpu.matmul %28, %30, %cst_10 {dimension_numbers = #tpu.dot_dimension_numbers<[2], [2], [1], [1], [0, 0, 0, 1, 1, 1], [0], [0]>} : vector<4x16x8xf32>, vector<4x16x8xf32>, vector<4x16x16xf32> -> vector<4x16x16xf32>
    "tpu.trace_stop"() : () -> ()
    %c0_11 = arith.constant 0 : index
    %c0_12 = arith.constant 0 : index
    %34 = vector.load %arg1[%c0_11, %c0_12] : memref<16x16xf32, #tpu.memory_space<vmem>>, vector<16x16xf32>
    %35 = vector.shape_cast %34 : vector<16x16xf32> to vector<1x16x16xf32>
    %36 = vector.broadcast %35 : vector<1x16x16xf32> to vector<4x16x16xf32>
    %37 = arith.addf %33, %36 : vector<4x16x16xf32>
    %cst_13 = arith.constant dense<0xFF800000> : vector<4x16xf32>
    %38 = vector.multi_reduction <maximumf>, %37, %cst_13 [2] : vector<4x16x16xf32> to vector<4x16xf32>
    %39 = vector.shape_cast %38 : vector<4x16xf32> to vector<4x16x1xf32>
    %40 = vector.broadcast %39 : vector<4x16x1xf32> to vector<4x16x16xf32>
    %41 = arith.subf %37, %40 : vector<4x16x16xf32>
    %42 = math.exp %41 : vector<4x16x16xf32>
    %cst_14 = arith.constant dense<0.000000e+00> : vector<4x16xf32>
    %43 = vector.multi_reduction <add>, %42, %cst_14 [2] : vector<4x16x16xf32> to vector<4x16xf32>
    %44 = vector.shape_cast %43 : vector<4x16xf32> to vector<4x16x1xf32>
    %45 = vector.broadcast %44 : vector<4x16x1xf32> to vector<4x16x16xf32>
    %46 = arith.divf %42, %45 : vector<4x16x16xf32>
    "tpu.trace_start"() <{level = 10 : i32, message = "hqk,hkd->hqd"}> : () -> ()
    %cst_15 = arith.constant dense<0.000000e+00> : vector<4x16x8xf32>
    %47 = tpu.matmul %46, %32, %cst_15 {dimension_numbers = #tpu.dot_dimension_numbers<[2], [1], [1], [2], [0, 0, 0, 1, 1, 2], [0], [0]>} : vector<4x16x16xf32>, vector<4x16x8xf32>, vector<4x16x8xf32> -> vector<4x16x8xf32>
    "tpu.trace_stop"() : () -> ()
    %48 = tpu.transpose %47, [1, 0, 2] : vector<4x16x8xf32> -> vector<16x4x8xf32>
    %49 = vector.shape_cast %48 : vector<16x4x8xf32> to vector<16x32xf32>
    %c0_16 = arith.constant 0 : index
    %c0_17 = arith.constant 0 : index
    %50 = vector.load %arg4[%c0_16, %c0_17] : memref<32x32xf32, #tpu.memory_space<vmem>>, vector<32x32xf32>
    %cst_18 = arith.constant dense<0.000000e+00> : vector<16x32xf32>
    %51 = tpu.matmul %49, %50, %cst_18 {dimension_numbers = #tpu.dot_dimension_numbers<[1], [0], [0], [1], [0, 0, 1, 1], [], []>} : vector<16x32xf32>, vector<32x32xf32>, vector<16x32xf32> -> vector<16x32xf32>
    %c0_19 = arith.constant 0 : index
    %c0_20 = arith.constant 0 : index
    %52 = vector.load %arg5[%c0_19, %c0_20] : memref<1x32xf32, #tpu.memory_space<vmem>>, vector<1x32xf32>
    %53 = vector.broadcast %52 : vector<1x32xf32> to vector<16x32xf32>
    %54 = arith.addf %51, %53 : vector<16x32xf32>
    %55 = arith.addf %0, %54 : vector<16x32xf32>
    %cst_21 = arith.constant dense<0.000000e+00> : vector<16xf32>
    %56 = vector.multi_reduction <add>, %55, %cst_21 [1] : vector<16x32xf32> to vector<16xf32>
    %57 = vector.shape_cast %56 : vector<16xf32> to vector<16x1xf32>
    %cst_22 = arith.constant 3.200000e+01 : f32
    %58 = vector.broadcast %cst_22 : f32 to vector<16x1xf32>
    %59 = arith.divf %57, %58 : vector<16x1xf32>
    %60 = vector.broadcast %59 : vector<16x1xf32> to vector<16x32xf32>
    %61 = arith.subf %55, %60 : vector<16x32xf32>
    %62 = arith.mulf %61, %61 : vector<16x32xf32>
    %cst_23 = arith.constant dense<0.000000e+00> : vector<16xf32>
    %63 = vector.multi_reduction <add>, %62, %cst_23 [1] : vector<16x32xf32> to vector<16xf32>
    %64 = vector.shape_cast %63 : vector<16xf32> to vector<16x1xf32>
    %cst_24 = arith.constant 3.200000e+01 : f32
    %65 = vector.broadcast %cst_24 : f32 to vector<16x1xf32>
    %66 = arith.divf %64, %65 : vector<16x1xf32>
    %67 = vector.broadcast %59 : vector<16x1xf32> to vector<16x32xf32>
    %68 = arith.subf %55, %67 : vector<16x32xf32>
    %cst_25 = arith.constant 9.99999974E-6 : f32
    %69 = vector.broadcast %cst_25 : f32 to vector<16x1xf32>
    %70 = arith.addf %66, %69 : vector<16x1xf32>
    %71 = math.rsqrt %70 : vector<16x1xf32>
    %72 = vector.broadcast %71 : vector<16x1xf32> to vector<16x32xf32>
    %73 = arith.mulf %68, %72 : vector<16x32xf32>
    %c0_26 = arith.constant 0 : index
    %c0_27 = arith.constant 0 : index
    %74 = vector.load %arg6[%c0_26, %c0_27] : memref<32x128xf32, #tpu.memory_space<vmem>>, vector<32x128xf32>
    %cst_28 = arith.constant dense<0.000000e+00> : vector<16x128xf32>
    %75 = tpu.matmul %73, %74, %cst_28 {dimension_numbers = #tpu.dot_dimension_numbers<[1], [0], [0], [1], [0, 0, 1, 1], [], []>} : vector<16x32xf32>, vector<32x128xf32>, vector<16x128xf32> -> vector<16x128xf32>
    %c0_29 = arith.constant 0 : index
    %c0_30 = arith.constant 0 : index
    %76 = vector.load %arg7[%c0_29, %c0_30] : memref<1x128xf32, #tpu.memory_space<vmem>>, vector<1x128xf32>
    %77 = vector.broadcast %76 : vector<1x128xf32> to vector<16x128xf32>
    %78 = arith.addf %75, %77 : vector<16x128xf32>
    %cst_31 = arith.constant 0.000000e+00 : f32
    %79 = vector.broadcast %cst_31 : f32 to vector<16x128xf32>
    %80 = arith.maximumf %78, %79 : vector<16x128xf32>
    %c0_32 = arith.constant 0 : index
    %c0_33 = arith.constant 0 : index
    %81 = vector.load %arg8[%c0_32, %c0_33] : memref<128x32xf32, #tpu.memory_space<vmem>>, vector<128x32xf32>
    %cst_34 = arith.constant dense<0.000000e+00> : vector<16x32xf32>
    %82 = tpu.matmul %80, %81, %cst_34 {dimension_numbers = #tpu.dot_dimension_numbers<[1], [0], [0], [1], [0, 0, 1, 1], [], []>} : vector<16x128xf32>, vector<128x32xf32>, vector<16x32xf32> -> vector<16x32xf32>
    %c0_35 = arith.constant 0 : index
    %c0_36 = arith.constant 0 : index
    %83 = vector.load %arg9[%c0_35, %c0_36] : memref<1x32xf32, #tpu.memory_space<vmem>>, vector<1x32xf32>
    %84 = vector.broadcast %83 : vector<1x32xf32> to vector<16x32xf32>
    %85 = arith.addf %82, %84 : vector<16x32xf32>
    %86 = arith.addf %55, %85 : vector<16x32xf32>
    %c0_37 = arith.constant 0 : index
    %c0_38 = arith.constant 0 : index
    %87 = vector.load %arg10[%c0_37, %c0_38] : memref<16x32xf32, #tpu.memory_space<vmem>>, vector<16x32xf32>
    tpu.vector_store %arg10[%c0_37, %c0_38], %86 {strides = array<i32>} : memref<16x32xf32, #tpu.memory_space<vmem>>, vector<16x32xf32>,
    return
  }
}

</mosaic_0001>

<bundles_post_ra>
// kernel: _block_call.1
= control target key start
LH: loop header
LB: loop body
LE: loop exit
PB: predicated region body
PF: predicated region fallthrough
CT: control target
= control target key end

     0   :  { %vm38_vm0 = vcmask 261120   ;;  %s3274_s0 = inlined_call_operand.vmem [shape: f32[16,32], index: 0, kind: input, shape index: {}]   ;;  %s3275_s1 = inlined_call_operand.vmem [shape: f32[16,16], index: 1, kind: input, shape index: {}]   ;;  %s3276_s2 = inlined_call_operand.vmem [shape: f32[32,96], index: 2, kind: input, shape index: {}]   ;;  %s3277_s3 = inlined_call_operand.vmem [shape: f32[1,96], index: 3, kind: input, shape index: {}]   ;;  %s3278_s4 = inlined_call_operand.vmem [shape: f32[32,32], index: 4, kind: input, shape index: {}]   ;;  %s3279_s5 = inlined_call_operand.vmem [shape: f32[1,32], index: 5, kind: input, shape index: {}]   ;;  %s3280_s6 = inlined_call_operand.vmem [shape: f32[32,128], index: 6, kind: input, shape index: {}]   ;;  %s3281_s7 = inlined_call_operand.vmem [shape: f32[1,128], index: 7, kind: input, shape index: {}]   ;;  %s3282_s8 = inlined_call_operand.vmem [shape: f32[128,32], index: 8, kind: input, shape index: {}]   ;;  %s3283_s9 = inlined_call_operand.vmem [shape: f32[1,32], index: 9, kind: input, shape index: {}]   ;;  %s3284_s10 = inlined_call_operand.hbm [shape: f32[16,32], index: 10, kind: output, shape index: {}]  }
   0x1   :  { %v36_v0 = vld [vmem:[%s3274_s0] sm:$0xff]  ;;  %v37_v1 = vld [vmem:[%s3274_s0 + $0x8] sm:$0xff] }
   0x2   :  { %15 = vsyncpa [#allocation3], 0  ;;  %v39_v2 = vsel %vm38_vm0, %v36_v0, 0.0  ;;  %v42_v3 = vsel %vm38_vm0, %v37_v1, 0.0  ;;  %v69_v14 = vld [vmem:[%s3276_s2 + $0x18] sm:$0xff]  ;;  %v68_v15 = vld [vmem:[%s3276_s2 + $0x10] sm:$0xff]  ;;  %v183_v39 = vlaneseq }
   0x3   :  { %40 = vadd.xlane.f32.xlu0 %v39_v2  ;;  %2559 = vmatprep.subr.mxu1 %v69_v14  ;;  %v67_v16 = vld [vmem:[%s3276_s2 + $0x8] sm:$0xff]  ;;  %v66_v17 = vld [vmem:[%s3276_s2] sm:$0xff]  ;;  %s2759_s26 = smov 112   ;;  %s2760_s27 = smov 120   ;;  %v2763_v37 = vmov 1983009808  }
   0x4   :  { %2560 = vmatpush3.msra.mxu1 %v69_v14  ;;  %v2441_v28 = vld [vmem:[%s3277_s3] ss:$0 sm:$0xff]  ;;  %s2761_s28 = smov 104   ;;  %s2762_s29 = smov 96   ;;  %v181_v38 = vunpack.c.l.s4 %v2763_v37  ;;  %v2764_v41 = vmov 1934713408  }
   0x5   :  { %2561 = vmatprep.subr.mxu1 %v68_v15  ;;  %v213_v42 = vunpack.c.l.s4 %v2764_v41  ;;  %v184_v44 = vshrl.u32 %v183_v39, 7  ;;  %vm1044_vm1 = vcmask 64512   ;;  %vm1393_vm2 = vcmask 130048   ;;  %s2766_s21 = smov 8   ;;  %s2767_s22 = smov 16  }
   0x6   :  { %2562 = vmatpush3.msra.mxu1 %v68_v15  ;;  %v182_v43 = vunpack.c.0.s8 %v181_v38  ;;  %vm2106_vm3 = vcmask 195584  }
   0x7   :  { %43 = vadd.xlane.f32.xlu0 %v42_v3  ;;  %2563 = vmatprep.subr.mxu1 %v67_v16  ;;  %v214_v48 = vunpack.c.0.s8 %v213_v42 }
   0x8   :  { %2564 = vmatpush3.msra.mxu1 %v67_v16  ;;  %v2886_v49 = vsub.s32 %v182_v43, %v184_v44 }
   0x9   :  { %2565 = vmatprep.subr.mxu1 %v66_v17  ;;  %v2897_v56 = vsub.s32 %v214_v48, %v184_v44 }
   0xa   :  { %2566 = vmatpush3.msra.mxu1 %v66_v17 }
  0x8c   :  { %v41_v4 = vpop.xlane.xlu0 %40 }
  0x8d   :  { %v46_v5 = vmul.f32 0.03125, %v41_v4 }
  0x8f   :  { %v48_v6 = vsub.f32 %v36_v0, %v46_v5 }
  0x90   :  { %v44_v7 = vpop.xlane.xlu0 %43 }
  0x91   :  { %v47_v8 = vmul.f32 0.03125, %v44_v7  ;;  %v50_v9 = vmul.f32 %v48_v6, %v48_v6 }
  0x93   :  { %v49_v10 = vsub.f32 %v37_v1, %v47_v8  ;;  %v52_v11 = vsel %vm38_vm0, %v50_v9, 0.0 }
  0x94   :  { %53 = vadd.xlane.f32.xlu1 %v52_v11 }
  0x95   :  { %v51_v12 = vmul.f32 %v49_v10, %v49_v10 }
  0x97   :  { %v55_v13 = vsel %vm38_vm0, %v51_v12, 0.0 }
  0x98   :  { %56 = vadd.xlane.f32.xlu1 %v55_v13 }
 0x11d   :  { %v54_v18 = vpop.xlane.xlu1 %53 }
 0x11e   :  { %v58_v19 = vmul.f32 0.03125, %v54_v18 }
 0x120   :  { %v60_v20 = vadd.f32 1e-05, %v58_v19 }
 0x121   :  { %v57_v21 = vpop.xlane.xlu1 %56 }
 0x122   :  { %2695 = vrsqrt.f32 %v60_v20  ;;  %v59_v22 = vmul.f32 0.03125, %v57_v21 }
 0x124   :  { %v61_v23 = vadd.f32 1e-05, %v59_v22 }
 0x126   :  { %2697 = vrsqrt.f32 %v61_v23 }
 0x12f   :  { %v2696_v24 = vpop.eup %2695 }
 0x130   :  { %v64_v25 = vmul.f32 %v2696_v24, %v48_v6 }
 0x132   :  { %2567 = vmatprep.mubr.msk.f32.mxu1 %vm38_vm0, %v64_v25 }
 0x133   :  { %v2698_v26 = vpop.eup %2697 }
 0x134   :  { %v65_v27 = vmul.f32 %v2698_v26, %v49_v10 }
 0x136   :  { %2568 = vmatmul.mubr.msk.f32.vlgmr.msra.gmra.mxu1 %vm38_vm0, %v65_v27 }
 0x1f6   :  { %v2569_v29 = vpop.f32.mrf.mxu1 }
 0x1f7   :  { %v2853_v30 = vadd.f32 %v2569_v29, %v2441_v28 }
 0x1f8   :  { %v149_v31 = vpop.f32.mrf.mxu1 }
 0x1f9   :  { %168 = vrot.lane.b32.xlu1 %v2853_v30, %s2759_s26  ;;  %162 = vrot.lane.b32.xlu0 %v2853_v30, %s2760_s27  ;;  %v2857_v32 = vadd.f32 %v2441_v28, %v149_v31 }
 0x1fd   :  { %174 = vrot.lane.b32.xlu1 %v2853_v30, %s2761_s28  ;;  %166 = vrot.lane.b32.xlu0 %v2857_v32, %s2759_s26 }
 0x201   :  { %452 = vrot.lane.b32.xlu0 %v2853_v30, %s2762_s29  ;;  %160 = vrot.lane.b32.xlu1 %v2857_v32, %s2760_s27 }
 0x205   :  { %450 = vrot.lane.b32.xlu0 %v2857_v32, %s2762_s29  ;;  %172 = vrot.lane.b32.xlu1 %v2857_v32, %s2761_s28 }
 0x26b   :  { %v2865_v33 = vpop.permute.xlu1 %168  ;;  %v2867_v34 = vpop.permute.xlu0 %162 }
 0x26c   :  { %460 = vrot.lane.b32.xlu0 %v2865_v33, %s2762_s29  ;;  %456 = vrot.lane.b32.xlu1 %v2867_v34, %s2762_s29  ;;  %v246_v23 = vcombine.low %v2853_v30, %v2865_v33  ;;  %v247_v26 = vcombine.high %v2853_v30, %v2865_v33 }
 0x26e   :  { %v254_v29 = vrot.slane %v246_v23, %v2886_v49  ;;  %v261_v38 = vrot.slane %v247_v26, %v2886_v49 }
 0x26f   :  { %v2871_v35 = vpop.permute.xlu1 %174  ;;  %v2873_v36 = vpop.permute.xlu0 %166 }
 0x270   :  { %458 = vrot.lane.b32.xlu0 %v2873_v36, %s2762_s29  ;;  %464 = vrot.lane.b32.xlu1 %v2871_v35, %s2762_s29  ;;  %v178_v45 = vcombine.low %v2857_v32, %v2873_v36  ;;  %v179_v46 = vcombine.high %v2857_v32, %v2873_v36  ;;  %v262_v22 = vcombine.low %v2867_v34, %v2871_v35 }
 0x271   :  { %v263_v24 = vcombine.high %v2867_v34, %v2871_v35 }
 0x272   :  { %v186_v52 = vrot.slane %v178_v45, %v2886_v49  ;;  %v193_v53 = vrot.slane %v179_v46, %v2886_v49  ;;  %v270_v27 = vrot.slane %v262_v22, %v2886_v49 }
 0x273   :  { %v2877_v40 = vpop.permute.xlu1 %160  ;;  %v453_v21 = vpop.permute.xlu0 %452  ;;  %v277_v31 = vrot.slane %v263_v24, %v2886_v49 }
 0x274   :  { %454 = vrot.lane.b32.xlu1 %v2877_v40, %s2762_s29  ;;  %v278_v39 = vcombine.low %v254_v29, %v270_v27  ;;  %v279_v41 = vcombine.high %v254_v29, %v270_v27 }
 0x275   :  { %v294_v44 = vcombine.low %v261_v38, %v277_v31  ;;  %v295_v45 = vcombine.high %v261_v38, %v277_v31 }
 0x277   :  { %v2884_v47 = vpop.permute.xlu1 %172  ;;  %v451_v25 = vpop.permute.xlu0 %450 }
 0x278   :  { %v194_v50 = vcombine.low %v2877_v40, %v2884_v47  ;;  %v195_v51 = vcombine.high %v2877_v40, %v2884_v47  ;;  %462 = vrot.lane.b32.xlu1 %v2884_v47, %s2762_s29 }
 0x27a   :  { %v202_v54 = vrot.slane %v194_v50, %v2886_v49  ;;  %v209_v55 = vrot.slane %v195_v51, %v2886_v49  ;;  %v286_v51 = vrot.slane %v278_v39, %v2897_v56 }
 0x27c   :  { %v210_v57 = vcombine.low %v186_v52, %v202_v54  ;;  %v211_v58 = vcombine.high %v186_v52, %v202_v54  ;;  %v226_v59 = vcombine.low %v193_v53, %v209_v55  ;;  %v227_v60 = vcombine.high %v193_v53, %v209_v55 }
 0x27d   :  { %v293_v52 = vrot.slane %v279_v41, %v2897_v56 }
 0x27e   :  { %v218_v61 = vrot.slane %v210_v57, %v2897_v56  ;;  %v225_v62 = vrot.slane %v211_v58, %v2897_v56  ;;  %v234_v63 = vrot.slane %v226_v59, %v2897_v56  ;;  %v241_v0 = vrot.slane %v227_v60, %v2897_v56 }
 0x27f   :  { %v302_v58 = vrot.slane %v294_v44, %v2897_v56  ;;  %v309_v59 = vrot.slane %v295_v45, %v2897_v56 }
 0x280   :  { %v314_v1 = vcombine.low %v218_v61, %v225_v62  ;;  %v2444_v2 = vcombine.high %v218_v61, %v225_v62  ;;  %v330_v3 = vcombine.low %v234_v63, %v241_v0  ;;  %v2445_v4 = vcombine.high %v234_v63, %v241_v0 }
 0x282   :  { %v321_v5 = vrot.slane %v314_v1, %v2886_v49  ;;  %v329_v6 = vrot.slane %v2444_v2, %v2886_v49  ;;  %v337_v7 = vrot.slane %v330_v3, %v2886_v49  ;;  %v345_v8 = vrot.slane %v2445_v4, %v2886_v49 }
 0x283   :  { %v382_v2 = vcombine.low %v286_v51, %v293_v52  ;;  %v2446_v3 = vcombine.high %v286_v51, %v293_v52 }
 0x284   :  { %v346_v9 = vcombine.low %v321_v5, %v329_v6  ;;  %v362_v10 = vcombine.low %v337_v7, %v345_v8  ;;  %v347_v11 = vcombine.high %v321_v5, %v329_v6  ;;  %v363_v12 = vcombine.high %v337_v7, %v345_v8 }
 0x285   :  { %v398_v8 = vcombine.low %v302_v58, %v309_v59  ;;  %v389_v23 = vrot.slane %v382_v2, %v2886_v49  ;;  %v397_v24 = vrot.slane %v2446_v3, %v2886_v49 }
 0x286   :  { %v2908_v13 = vrot.slane %v346_v9, %v2897_v56  ;;  %v2911_v14 = vrot.slane %v362_v10, %v2897_v56  ;;  %v2914_v15 = vrot.slane %v347_v11, %v2897_v56  ;;  %v2917_v16 = vrot.slane %v363_v12, %v2897_v56 }
 0x287   :  { %v2447_v9 = vcombine.high %v302_v58, %v309_v59 }
 0x288   :  { %v378_v17 = vcombine.low %v2908_v13, %v2911_v14  ;;  %v380_v18 = vcombine.low %v2914_v15, %v2917_v16  ;;  %v381_v19 = vcombine.high %v2914_v15, %v2917_v16  ;;  %v379_v20 = vcombine.high %v2908_v13, %v2911_v14  ;;  %v1043_v14 = vld [vmem:[%s3275_s1 + $0x8] sm:$0xff] }
 0x28a   :  { %2574 = vmatprep.mubr.msk.f32.mxu1 %vm1044_vm1, %v378_v17  ;;  %2595 = vmatprep.mubr.msk.f32.mxu0 %vm1044_vm1, %v381_v19 }
 0x2de   :  { %v457_v28 = vpop.permute.xlu1 %456  ;;  %v461_v37 = vpop.permute.xlu0 %460 }
 0x2df   :  { %v542_v42 = vcombine.low %v453_v21, %v461_v37  ;;  %v543_v43 = vcombine.high %v453_v21, %v461_v37 }
 0x2e1   :  { %v550_v53 = vrot.slane %v542_v42, %v2886_v49  ;;  %v557_v54 = vrot.slane %v543_v43, %v2886_v49 }
 0x2e2   :  { %v465_v46 = vpop.permute.xlu1 %464  ;;  %v459_v61 = vpop.permute.xlu0 %458 }
 0x2e3   :  { %v558_v48 = vcombine.low %v457_v28, %v465_v46  ;;  %v559_v50 = vcombine.high %v457_v28, %v465_v46  ;;  %v474_v10 = vcombine.low %v451_v25, %v459_v61  ;;  %v475_v11 = vcombine.high %v451_v25, %v459_v61 }
 0x2e4   :  { %v405_v61 = vrot.slane %v398_v8, %v2886_v49 }
 0x2e5   :  { %v566_v55 = vrot.slane %v558_v48, %v2886_v49  ;;  %v573_v57 = vrot.slane %v559_v50, %v2886_v49  ;;  %v482_v25 = vrot.slane %v474_v10, %v2886_v49  ;;  %v489_v38 = vrot.slane %v475_v11, %v2886_v49 }
 0x2e6   :  { %v455_v60 = vpop.permute.xlu1 %454  ;;  %v415_v11 = vcombine.high %v389_v23, %v397_v24 }
 0x2e7   :  { %v574_v62 = vcombine.low %v550_v53, %v566_v55  ;;  %v575_v63 = vcombine.high %v550_v53, %v566_v55  ;;  %v590_v0 = vcombine.low %v557_v54, %v573_v57  ;;  %v591_v1 = vcombine.high %v557_v54, %v573_v57 }
 0x2e9   :  { %v582_v4 = vrot.slane %v574_v62, %v2897_v56  ;;  %v589_v5 = vrot.slane %v575_v63, %v2897_v56  ;;  %v598_v6 = vrot.slane %v590_v0, %v2897_v56  ;;  %v605_v7 = vrot.slane %v591_v1, %v2897_v56 }
 0x2ea   :  { %v463_v12 = vpop.permute.xlu1 %462  ;;  %v413_v62 = vrot.slane %v2447_v9, %v2886_v49  ;;  %v414_v9 = vcombine.low %v389_v23, %v397_v24  ;;  %v429_v23 = vrot.slane %v415_v11, %v2897_v56 }
 0x2eb   :  { %v678_v17 = vcombine.low %v582_v4, %v589_v5  ;;  %v2450_v19 = vcombine.high %v582_v4, %v589_v5  ;;  %v694_v21 = vcombine.low %v598_v6, %v605_v7  ;;  %v2451_v22 = vcombine.high %v598_v6, %v605_v7 }
 0x2ec   :  { %v490_v26 = vcombine.low %v455_v60, %v463_v12  ;;  %v491_v27 = vcombine.high %v455_v60, %v463_v12  ;;  %v430_v10 = vcombine.low %v405_v61, %v413_v62  ;;  %v431_v12 = vcombine.high %v405_v61, %v413_v62 }
 0x2ed   :  { %v685_v28 = vrot.slane %v678_v17, %v2886_v49  ;;  %v693_v29 = vrot.slane %v2450_v19, %v2886_v49  ;;  %v701_v31 = vrot.slane %v694_v21, %v2886_v49  ;;  %v709_v37 = vrot.slane %v2451_v22, %v2886_v49 }
 0x2ee   :  { %v498_v39 = vrot.slane %v490_v26, %v2886_v49  ;;  %v505_v41 = vrot.slane %v491_v27, %v2886_v49  ;;  %v445_v24 = vrot.slane %v431_v12, %v2897_v56 }
 0x2ef   :  { %v710_v42 = vcombine.low %v685_v28, %v693_v29  ;;  %v726_v43 = vcombine.low %v701_v31, %v709_v37  ;;  %v711_v44 = vcombine.high %v685_v28, %v693_v29  ;;  %v727_v45 = vcombine.high %v701_v31, %v709_v37 }
 0x2f0   :  { %v506_v46 = vcombine.low %v482_v25, %v498_v39  ;;  %v507_v48 = vcombine.high %v482_v25, %v498_v39  ;;  %v522_v50 = vcombine.low %v489_v38, %v505_v41  ;;  %v523_v51 = vcombine.high %v489_v38, %v505_v41 }
 0x2f1   :  { %v718_v52 = vrot.slane %v710_v42, %v2897_v56  ;;  %v734_v53 = vrot.slane %v726_v43, %v2897_v56  ;;  %v725_v54 = vrot.slane %v711_v44, %v2897_v56  ;;  %v741_v55 = vrot.slane %v727_v45, %v2897_v56 }
 0x2f2   :  { %v514_v57 = vrot.slane %v506_v46, %v2897_v56  ;;  %v521_v58 = vrot.slane %v507_v48, %v2897_v56  ;;  %v530_v59 = vrot.slane %v522_v50, %v2897_v56  ;;  %v537_v60 = vrot.slane %v523_v51, %v2897_v56  ;;  %v1042_v50 = vld [vmem:[%s3275_s1] sm:$0xff]  ;;  %s2765_s1 = smov 64  }
 0x2f3   :  { %v742_v63 = vcombine.low %v718_v52, %v734_v53  ;;  %v745_v0 = vcombine.high %v725_v54, %v741_v55  ;;  %v422_v31 = vrot.slane %v414_v9, %v2897_v56  ;;  %v438_v37 = vrot.slane %v430_v10, %v2897_v56 }
 0x2f4   :  { %v610_v1 = vcombine.low %v514_v57, %v521_v58  ;;  %v2448_v2 = vcombine.high %v514_v57, %v521_v58  ;;  %v626_v3 = vcombine.low %v530_v59, %v537_v60  ;;  %v2449_v4 = vcombine.high %v530_v59, %v537_v60 }
 0x2f5   :  { %2570 = vmatprep.subr.msk.mxu1 %vm1044_vm1, %v742_v63  ;;  %2591 = vmatprep.subr.msk.mxu0 %vm1044_vm1, %v745_v0  ;;  %v743_v39 = vcombine.high %v718_v52, %v734_v53  ;;  %v446_v41 = vcombine.low %v422_v31, %v438_v37  ;;  %v449_v42 = vcombine.high %v429_v23, %v445_v24 }
 0x2f6   :  { %v617_v5 = vrot.slane %v610_v1, %v2886_v49  ;;  %v625_v6 = vrot.slane %v2448_v2, %v2886_v49  ;;  %v633_v7 = vrot.slane %v626_v3, %v2886_v49  ;;  %v641_v8 = vrot.slane %v2449_v4, %v2886_v49  ;;  %2571 = vmatpush3.xpose.msk.msra.mxu1 %vm1044_vm1, %v742_v63 }
 0x2f7   :  { %2592 = vmatpush3.xpose.msk.msra.mxu0 %vm1044_vm1, %v745_v0  ;;  %v744_v44 = vcombine.low %v725_v54, %v741_v55  ;;  %v447_v45 = vcombine.high %v422_v31, %v438_v37  ;;  %v448_v13 = vcombine.low %v429_v23, %v445_v24 }
 0x2f8   :  { %v642_v17 = vcombine.low %v617_v5, %v625_v6  ;;  %v658_v19 = vcombine.low %v633_v7, %v641_v8  ;;  %v643_v21 = vcombine.high %v617_v5, %v625_v6  ;;  %v659_v22 = vcombine.high %v633_v7, %v641_v8 }
 0x2fa   :  { %v650_v26 = vrot.slane %v642_v17, %v2897_v56  ;;  %v666_v27 = vrot.slane %v658_v19, %v2897_v56  ;;  %v657_v28 = vrot.slane %v643_v21, %v2897_v56  ;;  %v673_v29 = vrot.slane %v659_v22, %v2897_v56 }
 0x2fc   :  { %v674_v25 = vcombine.low %v650_v26, %v666_v27  ;;  %v677_v38 = vcombine.high %v657_v28, %v673_v29  ;;  %v675_v43 = vcombine.high %v650_v26, %v666_v27  ;;  %v676_v46 = vcombine.low %v657_v28, %v673_v29 }
 0x2fe   :  { %2572 = vmatprep.subr.msk.mxu1 %vm1044_vm1, %v674_v25  ;;  %2593 = vmatprep.subr.msk.mxu0 %vm1044_vm1, %v677_v38 }
 0x2ff   :  { %2573 = vmatpush3.xpose.msk.msra.mxu1 %vm1044_vm1, %v674_v25  ;;  %2594 = vmatpush3.xpose.msk.msra.mxu0 %vm1044_vm1, %v677_v38 }
 0x300   :  { %2577 = vmatprep.subr.msk.mxu1 %vm1044_vm1, %v743_v39 }
 0x302   :  { %2575 = vmatmul.mubr.msk.f32.vlgmr.msra.gmra.mxu1 %vm1044_vm1, %v446_v41  ;;  %2596 = vmatmul.mubr.msk.f32.vlgmr.msra.gmra.mxu0 %vm1044_vm1, %v449_v42 }
 0x303   :  { %2578 = vmatpush3.xpose.msk.msra.mxu1 %vm1044_vm1, %v743_v39  ;;  %2581 = vmatprep.mubr.msk.f32.mxu1 %vm1044_vm1, %v379_v20 }
 0x304   :  { %2579 = vmatprep.subr.msk.mxu1 %vm1044_vm1, %v675_v43 }
 0x307   :  { %2580 = vmatpush3.xpose.msk.msra.mxu1 %vm1044_vm1, %v675_v43 }
 0x308   :  { %2584 = vmatprep.subr.msk.mxu1 %vm1044_vm1, %v744_v44 }
 0x30a   :  { %2582 = vmatmul.mubr.msk.f32.vlgmr.msra.gmra.mxu1 %vm1044_vm1, %v447_v45 }
 0x30b   :  { %2585 = vmatpush3.xpose.msk.msra.mxu1 %vm1044_vm1, %v744_v44  ;;  %2588 = vmatprep.mubr.msk.f32.mxu1 %vm1044_vm1, %v380_v18 }
 0x30c   :  { %2586 = vmatprep.subr.msk.mxu1 %vm1044_vm1, %v676_v46 }
 0x30f   :  { %2587 = vmatpush3.xpose.msk.msra.mxu1 %vm1044_vm1, %v676_v46 }
 0x312   :  { %2589 = vmatmul.mubr.msk.f32.vlgmr.msra.gmra.mxu1 %vm1044_vm1, %v448_v13 }
 0x3c2   :  { %v2576_v20 = vpop.f32.mrf.mxu1  ;;  %v2597_v48 = vpop.f32.mrf.mxu0 }
 0x3c3   :  { %v1129_v15 = vadd.f32 %v2576_v20, %v1043_v14  ;;  %v1390_v55 = vadd.f32 %v2597_v48, %v1043_v14 }
 0x3c4   :  { %v1123_v16 = vpop.f32.mrf.mxu1  ;;  %v1384_v18 = vpop.f32.mrf.mxu0 }
 0x3c5   :  { %v1124_v51 = vadd.f32 %v1123_v16, %v1042_v50  ;;  %v1385_v52 = vadd.f32 %v1384_v18, %v1042_v50  ;;  %v1397_v53 = vsel %vm1393_vm2, %v1129_v15, -inf  ;;  %v1415_v62 = vsel %vm1393_vm2, %v1390_v55, -inf }
 0x3c6   :  { %1398 = vmax.xlane.f32.xlu1 %v1397_v53 }
 0x3c7   :  { %v1394_v54 = vsel %vm1393_vm2, %v1124_v51, -inf  ;;  %v1412_v57 = vsel %vm1393_vm2, %v1385_v52, -inf }
 0x3c8   :  { %1395 = vmax.xlane.f32.xlu0 %v1394_v54 }
 0x3ca   :  { %1413 = vmax.xlane.f32.xlu1 %v1412_v57  ;;  %v2583_v58 = vpop.f32.mrf.mxu1 }
 0x3cb   :  { %v1216_v59 = vadd.f32 %v2583_v58, %v1043_v14 }
 0x3cc   :  { %v1210_v60 = vpop.f32.mrf.mxu1 }
 0x3cd   :  { %v1211_v61 = vadd.f32 %v1210_v60, %v1042_v50  ;;  %v1403_v63 = vsel %vm1393_vm2, %v1216_v59, -inf }
 0x3ce   :  { %1416 = vmax.xlane.f32.xlu1 %v1415_v62  ;;  %1404 = vmax.xlane.f32.xlu0 %v1403_v63 }
 0x3cf   :  { %v1400_v0 = vsel %vm1393_vm2, %v1211_v61, -inf }
 0x3d2   :  { %v2590_v1 = vpop.f32.mrf.mxu1  ;;  %1401 = vmax.xlane.f32.xlu0 %v1400_v0 }
 0x3d3   :  { %v1303_v4 = vadd.f32 %v2590_v1, %v1043_v14 }
 0x3d4   :  { %v1297_v2 = vpop.f32.mrf.mxu1 }
 0x3d5   :  { %v1298_v3 = vadd.f32 %v1297_v2, %v1042_v50  ;;  %v1409_v6 = vsel %vm1393_vm2, %v1303_v4, -inf }
 0x3d7   :  { %v1406_v5 = vsel %vm1393_vm2, %v1298_v3, -inf }
 0x3d8   :  { %1407 = vmax.xlane.f32.xlu0 %v1406_v5 }
 0x3dc   :  { %1410 = vmax.xlane.f32.xlu0 %v1409_v6 }
 0x3df   :  { %752 = vrot.lane.b32.xlu1 %v2867_v34, %s2765_s1 }
 0x3e3   :  { %756 = vrot.lane.b32.xlu1 %v2865_v33, %s2765_s1 }
 0x3e7   :  { %760 = vrot.lane.b32.xlu1 %v2871_v35, %s2765_s1 }
 0x3eb   :  { %750 = vrot.lane.b32.xlu1 %v2877_v40, %s2765_s1 }
 0x3ef   :  { %758 = vrot.lane.b32.xlu1 %v2884_v47, %s2765_s1 }
 0x3f2   :  { %748 = vrot.lane.b32.xlu0 %v2853_v30, %s2765_s1 }
 0x3f6   :  { %746 = vrot.lane.b32.xlu0 %v2857_v32, %s2765_s1 }
 0x3fa   :  { %754 = vrot.lane.b32.xlu0 %v2873_v36, %s2765_s1 }
 0x44f   :  { %v1399_v7 = vpop.xlane.xlu1 %1398 }
 0x450   :  { %v1419_v8 = vsub.f32 %v1129_v15, %v1399_v7 }
 0x451   :  { %v1396_v9 = vpop.xlane.xlu0 %1395 }
 0x452   :  { %v1428_v10 = vmul.f32 1.442695, %v1419_v8  ;;  %v1418_v11 = vsub.f32 %v1124_v51, %v1396_v9 }
 0x453   :  { %v1414_v34 = vpop.xlane.xlu1 %1413 }
 0x454   :  { %2699 = vpow2.f32 %v1428_v10  ;;  %v1426_v33 = vmul.f32 1.442695, %v1418_v11  ;;  %v1424_v12 = vsub.f32 %v1385_v52, %v1414_v34 }
 0x456   :  { %2701 = vpow2.f32 %v1426_v33  ;;  %v1438_v35 = vmul.f32 1.442695, %v1424_v12 }
 0x457   :  { %v1417_v40 = vpop.xlane.xlu1 %1416  ;;  %v1405_v17 = vpop.xlane.xlu0 %1404 }
 0x458   :  { %2703 = vpow2.f32 %v1438_v35  ;;  %v1425_v47 = vsub.f32 %v1390_v55, %v1417_v40  ;;  %v1421_v30 = vsub.f32 %v1216_v59, %v1405_v17 }
 0x45a   :  { %v1432_v19 = vmul.f32 1.442695, %v1421_v30  ;;  %v1440_v32 = vmul.f32 1.442695, %v1425_v47 }
 0x45b   :  { %v753_v21 = vpop.permute.xlu1 %752  ;;  %v1402_v36 = vpop.xlane.xlu0 %1401 }
 0x45c   :  { %v1420_v22 = vsub.f32 %v1211_v61, %v1402_v36  ;;  %2705 = vpow2.f32 %v1432_v19 }
 0x45d   :  { %2707 = vpow2.f32 %v1440_v32 }
 0x45e   :  { %v1430_v26 = vmul.f32 1.442695, %v1420_v22 }
 0x45f   :  { %v757_v27 = vpop.permute.xlu1 %756 }
 0x460   :  { %2709 = vpow2.f32 %v1430_v26 }
 0x461   :  { %v3035_v28 = vpop.eup %2699  ;;  %v1408_v29 = vpop.xlane.xlu0 %1407 }
 0x462   :  { %v1422_v31 = vsub.f32 %v1298_v3, %v1408_v29  ;;  %v1445_v37 = vsel %vm1393_vm2, %v3035_v28, 0.0 }
 0x463   :  { %v3039_v25 = vpop.eup %2701  ;;  %1446 = vadd.xlane.f32.xlu1 %v1445_v37  ;;  %v761_v38 = vpop.permute.xlu1 %760 }
 0x464   :  { %v1434_v23 = vmul.f32 1.442695, %v1422_v31  ;;  %v1442_v24 = vsel %vm1393_vm2, %v3039_v25, 0.0  ;;  %v854_v45 = vcombine.low %v753_v21, %v761_v38  ;;  %v855_v46 = vcombine.high %v753_v21, %v761_v38 }
 0x465   :  { %v3043_v39 = vpop.eup %2703  ;;  %1443 = vadd.xlane.f32.xlu0 %v1442_v24  ;;  %v1411_v41 = vpop.xlane.xlu0 %1410 }
 0x466   :  { %2711 = vpow2.f32 %v1434_v23  ;;  %v1423_v42 = vsub.f32 %v1303_v4, %v1411_v41  ;;  %v1460_v43 = vsel %vm1393_vm2, %v3043_v39, 0.0  ;;  %v862_v18 = vrot.slane %v854_v45, %v2886_v49 }
 0x467   :  { %v751_v44 = vpop.permute.xlu1 %750  ;;  %1461 = vadd.xlane.f32.xlu1 %v1460_v43  ;;  %v869_v51 = vrot.slane %v855_v46, %v2886_v49 }
 0x468   :  { %v1436_v13 = vmul.f32 1.442695, %v1423_v42 }
 0x469   :  { %v749_v14 = vpop.permute.xlu0 %748  ;;  %v3047_v20 = vpop.eup %2705 }
 0x46a   :  { %2713 = vpow2.f32 %v1436_v13  ;;  %v838_v48 = vcombine.low %v749_v14, %v757_v27  ;;  %v839_v50 = vcombine.high %v749_v14, %v757_v27  ;;  %v1451_v15 = vsel %vm1393_vm2, %v3047_v20, 0.0  ;;  %v3051_v16 = vpop.eup %2707 }
 0x46b   :  { %v759_v54 = vpop.permute.xlu1 %758  ;;  %1452 = vadd.xlane.f32.xlu1 %v1451_v15  ;;  %v1463_v63 = vsel %vm1393_vm2, %v3051_v16, 0.0 }
 0x46c   :  { %v846_v52 = vrot.slane %v838_v48, %v2886_v49  ;;  %v853_v53 = vrot.slane %v839_v50, %v2886_v49  ;;  %v786_v62 = vcombine.low %v751_v44, %v759_v54  ;;  %v787_v5 = vcombine.high %v751_v44, %v759_v54 }
 0x46d   :  { %v3057_v55 = vpop.eup %2709  ;;  %v747_v57 = vpop.permute.xlu0 %746 }
 0x46e   :  { %v870_v58 = vcombine.low %v846_v52, %v862_v18  ;;  %v871_v59 = vcombine.high %v846_v52, %v862_v18  ;;  %v886_v60 = vcombine.low %v853_v53, %v869_v51  ;;  %v887_v61 = vcombine.high %v853_v53, %v869_v51 }
 0x46f   :  { %v1448_v0 = vsel %vm1393_vm2, %v3057_v55, 0.0  ;;  %1464 = vadd.xlane.f32.xlu1 %v1463_v63  ;;  %v794_v34 = vrot.slane %v786_v62, %v2886_v49  ;;  %v801_v30 = vrot.slane %v787_v5, %v2886_v49 }
 0x470   :  { %v878_v1 = vrot.slane %v870_v58, %v2897_v56  ;;  %v885_v2 = vrot.slane %v871_v59, %v2897_v56  ;;  %v894_v3 = vrot.slane %v886_v60, %v2897_v56  ;;  %v901_v4 = vrot.slane %v887_v61, %v2897_v56  ;;  %1449 = vadd.xlane.f32.xlu0 %v1448_v0 }
 0x471   :  { %v755_v6 = vpop.permute.xlu0 %754 }
 0x472   :  { %v974_v7 = vcombine.low %v878_v1, %v885_v2  ;;  %v2454_v8 = vcombine.high %v878_v1, %v885_v2  ;;  %v990_v9 = vcombine.low %v894_v3, %v901_v4  ;;  %v2455_v10 = vcombine.high %v894_v3, %v901_v4 }
 0x473   :  { %v3067_v11 = vpop.eup %2711  ;;  %v770_v33 = vcombine.low %v747_v57, %v755_v6  ;;  %v771_v12 = vcombine.high %v747_v57, %v755_v6 }
 0x474   :  { %v1454_v35 = vsel %vm1393_vm2, %v3067_v11, 0.0  ;;  %v981_v40 = vrot.slane %v974_v7, %v2886_v49  ;;  %v989_v17 = vrot.slane %v2454_v8, %v2886_v49  ;;  %v997_v47 = vrot.slane %v990_v9, %v2886_v49 }
 0x475   :  { %v778_v19 = vrot.slane %v770_v33, %v2886_v49  ;;  %v785_v32 = vrot.slane %v771_v12, %v2886_v49  ;;  %1455 = vadd.xlane.f32.xlu0 %v1454_v35  ;;  %v1005_v21 = vrot.slane %v2455_v10, %v2886_v49 }
 0x476   :  { %v1006_v36 = vcombine.low %v981_v40, %v989_v17  ;;  %v1007_v22 = vcombine.high %v981_v40, %v989_v17 }
 0x477   :  { %v3079_v26 = vpop.eup %2713  ;;  %v802_v27 = vcombine.low %v778_v19, %v794_v34  ;;  %v803_v29 = vcombine.high %v778_v19, %v794_v34  ;;  %v818_v31 = vcombine.low %v785_v32, %v801_v30  ;;  %v819_v37 = vcombine.high %v785_v32, %v801_v30 }
 0x478   :  { %v1457_v38 = vsel %vm1393_vm2, %v3079_v26, 0.0  ;;  %v1014_v23 = vrot.slane %v1006_v36, %v2897_v56  ;;  %v1022_v24 = vcombine.low %v997_v47, %v1005_v21  ;;  %v1021_v46 = vrot.slane %v1007_v22, %v2897_v56 }
 0x479   :  { %v810_v41 = vrot.slane %v802_v27, %v2897_v56  ;;  %v817_v42 = vrot.slane %v803_v29, %v2897_v56  ;;  %v826_v43 = vrot.slane %v818_v31, %v2897_v56  ;;  %v833_v44 = vrot.slane %v819_v37, %v2897_v56  ;;  %1458 = vadd.xlane.f32.xlu0 %v1457_v38 }
 0x47a   :  { %v1030_v45 = vrot.slane %v1022_v24, %v2897_v56  ;;  %v1023_v13 = vcombine.high %v997_v47, %v1005_v21 }
 0x47b   :  { %v906_v14 = vcombine.low %v810_v41, %v817_v42  ;;  %v2452_v48 = vcombine.high %v810_v41, %v817_v42  ;;  %v922_v50 = vcombine.low %v826_v43, %v833_v44  ;;  %v2453_v15 = vcombine.high %v826_v43, %v833_v44 }
 0x47c   :  { %v1038_v18 = vcombine.low %v1014_v23, %v1030_v45  ;;  %v1037_v51 = vrot.slane %v1023_v13, %v2897_v56  ;;  %v1039_v8 = vcombine.high %v1014_v23, %v1030_v45 }
 0x47d   :  { %v913_v52 = vrot.slane %v906_v14, %v2886_v49  ;;  %v921_v53 = vrot.slane %v2452_v48, %v2886_v49  ;;  %v929_v54 = vrot.slane %v922_v50, %v2886_v49  ;;  %v937_v57 = vrot.slane %v2453_v15, %v2886_v49 }
 0x47e   :  { %2598 = vmatprep.subr.mxu1 %v1038_v18  ;;  %v1040_v58 = vcombine.low %v1021_v46, %v1037_v51  ;;  %v1041_v59 = vcombine.high %v1021_v46, %v1037_v51 }
 0x47f   :  { %2599 = vmatpush3.msra.mxu1 %v1038_v18  ;;  %v938_v60 = vcombine.low %v913_v52, %v921_v53  ;;  %v954_v61 = vcombine.low %v929_v54, %v937_v57  ;;  %v939_v62 = vcombine.high %v913_v52, %v921_v53  ;;  %v955_v63 = vcombine.high %v929_v54, %v937_v57 }
 0x480   :  { %2612 = vmatprep.subr.mxu0 %v1040_v58 }
 0x481   :  { %2613 = vmatpush3.msra.mxu0 %v1040_v58  ;;  %v946_v0 = vrot.slane %v938_v60, %v2897_v56  ;;  %v962_v1 = vrot.slane %v954_v61, %v2897_v56  ;;  %v953_v2 = vrot.slane %v939_v62, %v2897_v56  ;;  %v969_v3 = vrot.slane %v955_v63, %v2897_v56 }
 0x483   :  { %v970_v4 = vcombine.low %v946_v0, %v962_v1  ;;  %v972_v5 = vcombine.low %v953_v2, %v969_v3  ;;  %v971_v6 = vcombine.high %v946_v0, %v962_v1  ;;  %v973_v7 = vcombine.high %v953_v2, %v969_v3 }
 0x485   :  { %2600 = vmatprep.subr.mxu1 %v970_v4  ;;  %2614 = vmatprep.subr.mxu0 %v972_v5 }
 0x486   :  { %2601 = vmatpush3.msra.mxu1 %v970_v4  ;;  %2615 = vmatpush3.msra.mxu0 %v972_v5 }
 0x487   :  { %2605 = vmatprep.subr.mxu1 %v1039_v8 }
 0x4ec   :  { %v1447_v9 = vpop.xlane.xlu1 %1446 }
 0x4ed   :  { %2715 = vrcp.f32 %v1447_v9 }
 0x4ee   :  { %v1444_v10 = vpop.xlane.xlu0 %1443 }
 0x4ef   :  { %2717 = vrcp.f32 %v1444_v10 }
 0x4f0   :  { %v1462_v34 = vpop.xlane.xlu1 %1461 }
 0x4f1   :  { %2719 = vrcp.f32 %v1462_v34 }
 0x4f4   :  { %v1453_v33 = vpop.xlane.xlu1 %1452 }
 0x4f5   :  { %2721 = vrcp.f32 %v1453_v33 }
 0x4f8   :  { %v1465_v40 = vpop.xlane.xlu1 %1464 }
 0x4f9   :  { %v1450_v12 = vpop.xlane.xlu0 %1449 }
 0x4fa   :  { %v2716_v35 = vpop.eup %2715  ;;  %2723 = vrcp.f32 %v1450_v12 }
 0x4fb   :  { %2725 = vrcp.f32 %v1465_v40  ;;  %v1469_v19 = vmul.f32 %v2716_v35, %v3035_v28  ;;  %v2112_v40 = vld [vmem:[%s3278_s4 + $0x18] sm:$0xff] }
 0x4fc   :  { %v2718_v17 = vpop.eup %2717  ;;  %2626 = vmatprep.subr.mxu0 %v2112_v40 }
 0x4fd   :  { %v1467_v47 = vmul.f32 %v2718_v17, %v3039_v25 }
 0x4fe   :  { %v1456_v30 = vpop.xlane.xlu0 %1455  ;;  %v2720_v21 = vpop.eup %2719 }
 0x4ff   :  { %2727 = vrcp.f32 %v1456_v30  ;;  %2602 = vmatprep.mubr.msk.f32.mxu1 %vm1393_vm2, %v1467_v47  ;;  %v1479_v28 = vmul.f32 %v2720_v21, %v3043_v39 }
 0x500   :  { %2603 = vmatmul.mubr.msk.f32.vlgmr.msra.gmra.mxu1 %vm1393_vm2, %v1469_v19 }
 0x501   :  { %2606 = vmatpush3.msra.mxu1 %v1039_v8 }
 0x502   :  { %2607 = vmatprep.subr.mxu1 %v971_v6  ;;  %v1459_v32 = vpop.xlane.xlu0 %1458  ;;  %v2722_v36 = vpop.eup %2721 }
 0x503   :  { %2608 = vmatpush3.msra.mxu1 %v971_v6  ;;  %2729 = vrcp.f32 %v1459_v32  ;;  %v1473_v27 = vmul.f32 %v2722_v36, %v3047_v20 }
 0x504   :  { %2619 = vmatprep.subr.mxu1 %v1041_v59 }
 0x507   :  { %v2724_v22 = vpop.eup %2723 }
 0x508   :  { %v1471_v25 = vmul.f32 %v2724_v22, %v3057_v55  ;;  %v2726_v29 = vpop.eup %2725 }
 0x509   :  { %v1481_v38 = vmul.f32 %v2726_v29, %v3051_v16 }
 0x50a   :  { %2609 = vmatprep.mubr.msk.f32.mxu1 %vm1393_vm2, %v1471_v25 }
 0x50b   :  { %2610 = vmatmul.mubr.msk.f32.vlgmr.msra.gmra.mxu1 %vm1393_vm2, %v1473_v27 }
 0x50c   :  { %v2728_v31 = vpop.eup %2727  ;;  %2620 = vmatpush3.msra.mxu1 %v1041_v59  ;;  %2623 = vmatprep.mubr.msk.f32.mxu1 %vm1393_vm2, %v1479_v28 }
 0x50d   :  { %v1475_v37 = vmul.f32 %v2728_v31, %v3067_v11  ;;  %2621 = vmatprep.subr.mxu1 %v973_v7  ;;  %v2111_v31 = vld [vmem:[%s3278_s4 + $0x10] sm:$0xff] }
 0x50e   :  { %2622 = vmatpush3.msra.mxu1 %v973_v7 }
 0x50f   :  { %2616 = vmatprep.mubr.msk.f32.mxu0 %vm1393_vm2, %v1475_v37  ;;  %2624 = vmatmul.mubr.msk.f32.vlgmr.msra.gmra.mxu1 %vm1393_vm2, %v1481_v38 }
 0x510   :  { %v2730_v20 = vpop.eup %2729 }
 0x511   :  { %v1477_v55 = vmul.f32 %v2730_v20, %v3079_v26 }
 0x513   :  { %2617 = vmatmul.mubr.msk.f32.vlgmr.msra.gmra.mxu0 %vm1393_vm2, %v1477_v55 }
 0x514   :  { %2627 = vmatpush3.msra.mxu0 %v2112_v40 }
 0x515   :  { %2628 = vmatprep.subr.mxu0 %v2111_v31 }
 0x516   :  { %2629 = vmatpush3.msra.mxu0 %v2111_v31  ;;  %v2338_v31 = vld [vmem:[%s3282_s8 + $0x78] sm:$0xff] }
 0x5c0   :  { %v2604_v39 = vpop.f32.mrf.mxu1 }
 0x5c2   :  { %v1554_v23 = vpop.f32.mrf.mxu1 }
 0x5cb   :  { %v2611_v24 = vpop.f32.mrf.mxu1 }
 0x5cd   :  { %v1635_v41 = vpop.f32.mrf.mxu1 }
 0x5cf   :  { %v2625_v42 = vpop.f32.mrf.mxu1 }
 0x5d0   :  { %v1890_v43 = vcombine.low %v2611_v24, %v2625_v42  ;;  %v1891_v11 = vcombine.high %v2611_v24, %v2625_v42 }
 0x5d1   :  { %v1797_v44 = vpop.f32.mrf.mxu1 }
 0x5d2   :  { %v1898_v13 = vrot.slane %v1890_v43, %v2886_v49  ;;  %v1905_v14 = vrot.slane %v1891_v11, %v2886_v49  ;;  %v1822_v48 = vcombine.low %v1635_v41, %v1797_v44  ;;  %v1823_v50 = vcombine.high %v1635_v41, %v1797_v44 }
 0x5d3   :  { %v2618_v45 = vpop.f32.mrf.mxu0 }
 0x5d4   :  { %v1874_v16 = vcombine.low %v2604_v39, %v2618_v45  ;;  %v1875_v46 = vcombine.high %v2604_v39, %v2618_v45  ;;  %v1830_v59 = vrot.slane %v1822_v48, %v2886_v49  ;;  %v1837_v60 = vrot.slane %v1823_v50, %v2886_v49  ;;  %v2110_v39 = vld [vmem:[%s3278_s4 + $0x8] sm:$0xff] }
 0x5d5   :  { %v1716_v26 = vpop.f32.mrf.mxu0  ;;  %2630 = vmatprep.subr.mxu0 %v2110_v39 }
 0x5d6   :  { %v1882_v15 = vrot.slane %v1874_v16, %v2886_v49  ;;  %v1889_v18 = vrot.slane %v1875_v46, %v2886_v49  ;;  %v1806_v51 = vcombine.low %v1554_v23, %v1716_v26  ;;  %v1807_v52 = vcombine.high %v1554_v23, %v1716_v26  ;;  %2631 = vmatpush3.msra.mxu0 %v2110_v39  ;;  %v2109_v46 = vld [vmem:[%s3278_s4] sm:$0xff]  ;;  %s2768_s4 = smov 24   ;;  %v2333_v39 = vld [vmem:[%s3282_s8 + $0x50] sm:$0xff] }
 0x5d7   :  { %2632 = vmatprep.subr.mxu0 %v2109_v46 }
 0x5d8   :  { %v1906_v53 = vcombine.low %v1882_v15, %v1898_v13  ;;  %v1907_v54 = vcombine.high %v1882_v15, %v1898_v13  ;;  %v1922_v57 = vcombine.low %v1889_v18, %v1905_v14  ;;  %v1923_v58 = vcombine.high %v1889_v18, %v1905_v14  ;;  %2633 = vmatpush3.msra.mxu0 %v2109_v46 }
 0x5d9   :  { %v1814_v61 = vrot.slane %v1806_v51, %v2886_v49  ;;  %v1821_v62 = vrot.slane %v1807_v52, %v2886_v49  ;;  %2648 = vmatprep.subr.mxu0 %v2338_v31 }
 0x5da   :  { %v1914_v63 = vrot.slane %v1906_v53, %v2897_v56  ;;  %v1921_v0 = vrot.slane %v1907_v54, %v2897_v56  ;;  %v1930_v1 = vrot.slane %v1922_v57, %v2897_v56  ;;  %v1937_v2 = vrot.slane %v1923_v58, %v2897_v56 }
 0x5db   :  { %v1838_v3 = vcombine.low %v1814_v61, %v1830_v59  ;;  %v1839_v4 = vcombine.high %v1814_v61, %v1830_v59  ;;  %v1854_v5 = vcombine.low %v1821_v62, %v1837_v60  ;;  %v1855_v6 = vcombine.high %v1821_v62, %v1837_v60 }
 0x5dc   :  { %v2010_v7 = vcombine.low %v1914_v63, %v1921_v0  ;;  %v2482_v8 = vcombine.high %v1914_v63, %v1921_v0  ;;  %v2026_v9 = vcombine.low %v1930_v1, %v1937_v2  ;;  %v2483_v10 = vcombine.high %v1930_v1, %v1937_v2 }
 0x5dd   :  { %v1846_v34 = vrot.slane %v1838_v3, %v2897_v56  ;;  %v1853_v33 = vrot.slane %v1839_v4, %v2897_v56  ;;  %v1862_v12 = vrot.slane %v1854_v5, %v2897_v56  ;;  %v1869_v35 = vrot.slane %v1855_v6, %v2897_v56  ;;  %v2484_v3 = vld [vmem:[%s3279_s5] ss:$0 sm:$0xff] }
 0x5de   :  { %v2017_v17 = vrot.slane %v2010_v7, %v2886_v49  ;;  %v2025_v47 = vrot.slane %v2482_v8, %v2886_v49  ;;  %v2033_v30 = vrot.slane %v2026_v9, %v2886_v49  ;;  %v2041_v19 = vrot.slane %v2483_v10, %v2886_v49  ;;  %v2735_v7 = vld [vmem:[%s3274_s0 + $0x8] sm:$0xff]  ;;  %v2736_v10 = vld [vmem:[%s3274_s0] sm:$0xff] }
 0x5df   :  { %v1942_v32 = vcombine.low %v1846_v34, %v1853_v33  ;;  %v2480_v21 = vcombine.high %v1846_v34, %v1853_v33  ;;  %v1958_v36 = vcombine.low %v1862_v12, %v1869_v35  ;;  %v2481_v22 = vcombine.high %v1862_v12, %v1869_v35 }
 0x5e0   :  { %v2042_v25 = vcombine.low %v2017_v17, %v2025_v47  ;;  %v2058_v27 = vcombine.low %v2033_v30, %v2041_v19  ;;  %v2043_v29 = vcombine.high %v2017_v17, %v2025_v47  ;;  %v2059_v28 = vcombine.high %v2033_v30, %v2041_v19 }
 0x5e1   :  { %v1949_v37 = vrot.slane %v1942_v32, %v2886_v49  ;;  %v1957_v38 = vrot.slane %v2480_v21, %v2886_v49  ;;  %v1965_v20 = vrot.slane %v1958_v36, %v2886_v49  ;;  %v1973_v55 = vrot.slane %v2481_v22, %v2886_v49 }
 0x5e2   :  { %v2050_v23 = vrot.slane %v2042_v25, %v2897_v56  ;;  %v2066_v24 = vrot.slane %v2058_v27, %v2897_v56  ;;  %v2057_v45 = vrot.slane %v2043_v29, %v2897_v56  ;;  %v2073_v49 = vrot.slane %v2059_v28, %v2897_v56  ;;  %v2232_v25 = vld [vmem:[%s3280_s6 + $0x18] sm:$0xff]  ;;  %v2231_v27 = vld [vmem:[%s3280_s6 + $0x10] sm:$0xff]  ;;  %v2230_v29 = vld [vmem:[%s3280_s6 + $0x8] sm:$0xff] }
 0x5e3   :  { %v1974_v41 = vcombine.low %v1949_v37, %v1957_v38  ;;  %v1990_v42 = vcombine.low %v1965_v20, %v1973_v55  ;;  %v1975_v43 = vcombine.high %v1949_v37, %v1957_v38  ;;  %v1991_v11 = vcombine.high %v1965_v20, %v1973_v55  ;;  %2637 = vmatprep.subr.mxu1 %v2232_v25  ;;  %v2229_v28 = vld [vmem:[%s3280_s6] sm:$0xff]  ;;  %v2337_v37 = vld [vmem:[%s3282_s8 + $0x70] sm:$0xff]  ;;  %v2336_v38 = vld [vmem:[%s3282_s8 + $0x68] sm:$0xff] }
 0x5e4   :  { %v2075_v44 = vcombine.high %v2050_v23, %v2066_v24  ;;  %v2074_v16 = vcombine.low %v2050_v23, %v2066_v24  ;;  %v2076_v18 = vcombine.low %v2057_v45, %v2073_v49  ;;  %v2077_v52 = vcombine.high %v2057_v45, %v2073_v49  ;;  %2638 = vmatpush3.msra.mxu1 %v2232_v25  ;;  %v2335_v20 = vld [vmem:[%s3282_s8 + $0x60] sm:$0xff]  ;;  %v2334_v55 = vld [vmem:[%s3282_s8 + $0x58] sm:$0xff]  ;;  %v2332_v23 = vld [vmem:[%s3282_s8 + $0x48] sm:$0xff] }
 0x5e5   :  { %v1982_v13 = vrot.slane %v1974_v41, %v2897_v56  ;;  %v1998_v14 = vrot.slane %v1990_v42, %v2897_v56  ;;  %v1989_v50 = vrot.slane %v1975_v43, %v2897_v56  ;;  %v2005_v26 = vrot.slane %v1991_v11, %v2897_v56  ;;  %2639 = vmatprep.subr.mxu1 %v2231_v27  ;;  %v2331_v24 = vld [vmem:[%s3282_s8 + $0x40] sm:$0xff]  ;;  %v2330_v41 = vld [vmem:[%s3282_s8 + $0x38] sm:$0xff]  ;;  %v2329_v42 = vld [vmem:[%s3282_s8 + $0x30] sm:$0xff] }
 0x5e6   :  { %2082 = vrot.lane.b32.xlu1 %v2075_v44, %s2766_s21  ;;  %2640 = vmatpush3.msra.mxu1 %v2231_v27  ;;  %v2328_v43 = vld [vmem:[%s3282_s8 + $0x28] sm:$0xff]  ;;  %v2327_v11 = vld [vmem:[%s3282_s8 + $0x20] sm:$0xff] }
 0x5e7   :  { %v2007_v48 = vcombine.high %v1982_v13, %v1998_v14  ;;  %v2006_v15 = vcombine.low %v1982_v13, %v1998_v14  ;;  %v2008_v51 = vcombine.low %v1989_v50, %v2005_v26  ;;  %v2009_v53 = vcombine.high %v1989_v50, %v2005_v26  ;;  %2641 = vmatprep.subr.mxu1 %v2230_v29 }
 0x5e8   :  { %2642 = vmatpush3.msra.mxu1 %v2230_v29 }
 0x5e9   :  { %2080 = vrot.lane.b32.xlu0 %v2007_v48, %s2766_s21  ;;  %2643 = vmatprep.subr.mxu1 %v2229_v28 }
 0x5ea   :  { %2090 = vrot.lane.b32.xlu1 %v2076_v18, %s2767_s22  ;;  %2644 = vmatpush3.msra.mxu1 %v2229_v28  ;;  %v2325_v18 = vld [vmem:[%s3282_s8 + $0x10] sm:$0xff] }
 0x5ed   :  { %2088 = vrot.lane.b32.xlu0 %v2008_v51, %s2767_s22  ;;  %v2324_v51 = vld [vmem:[%s3282_s8 + $0x8] sm:$0xff] }
 0x5ee   :  { %2098 = vrot.lane.b32.xlu1 %v2077_v52, %s2768_s4  ;;  %v2323_v52 = vld [vmem:[%s3282_s8] sm:$0xff] }
 0x5f1   :  { %2096 = vrot.lane.b32.xlu0 %v2009_v53, %s2768_s4  ;;  %v2487_v53 = vld [vmem:[%s3281_s7] ss:$0 sm:$0xff] }
 0x658   :  { %v2083_v54 = vpop.permute.xlu1 %2082 }
 0x659   :  { %v2103_v61 = vsel %vm1044_vm1, %v2074_v16, %v2083_v54 }
 0x65b   :  { %v2081_v57 = vpop.permute.xlu0 %2080 }
 0x65c   :  { %v2091_v58 = vpop.permute.xlu1 %2090  ;;  %v2102_v60 = vsel %vm1044_vm1, %v2006_v15, %v2081_v57  ;;  %v2326_v15 = vld [vmem:[%s3282_s8 + $0x18] sm:$0xff]  ;;  %s2769_s8 = smov [#allocation2]  }
 0x65d   :  { %v2105_v0 = vsel %vm1393_vm2, %v2103_v61, %v2091_v58  ;;  %v2490_v61 = vld [vmem:[%s3283_s9] ss:$0 sm:$0xff]  ;;  %s2430_s22 = sshll.u32 %s2769_s8, 4  ;;  %s2431_s22 = int_to_ptr.vmem [resolvable:$true] %s2430_s22 }
 0x65e   :  { %s2737_s7 = scalar_lea.vmem %s2431_s22, 256  ;;  %p2742_p1 = scmp.lt.s32.totalorder %s2431_s22, %s2431_s22 }
 0x65f   :  { %v2089_v59 = vpop.permute.xlu0 %2088  ;;  %p2738_p0 = scmp.ne.s32.totalorder %s2431_s22, %s2737_s7  ;;  %p2743_p2 = scmp.lt.s32.totalorder %s2737_s7, %s2737_s7 }
 0x660   :  { %v2099_v56 = vpop.permute.xlu1 %2098  ;;  %v2104_v62 = vsel %vm1393_vm2, %v2102_v60, %v2089_v59 }
 0x661   :  { %v2108_v2 = vsel %vm2106_vm3, %v2105_v0, %v2099_v56  ;;  %p2744_p3 = por %p2743_p2, %p2742_p1 }
 0x663   :  { %v2097_v63 = vpop.permute.xlu0 %2096  ;;  %p2745_p4 = pnand %p2744_p3, %p2738_p0 }
 0x664   :  { %v2107_v1 = vsel %vm2106_vm3, %v2104_v62, %v2097_v63 }
 0x665   :  { %2634 = vmatprep.mubr.msk.f32.mxu0 %vm38_vm0, %v2107_v1 }
 0x666   :  { %2635 = vmatmul.mubr.msk.f32.vlgmr.msra.gmra.mxu0 %vm38_vm0, %v2108_v2 }
 0x667   :  { %2649 = vmatpush3.msra.mxu0 %v2338_v31 }
 0x668   :  { %2650 = vmatprep.subr.mxu0 %v2337_v37 }
 0x669   :  { %2651 = vmatpush3.msra.mxu0 %v2337_v37 }
 0x66a   :  { %2652 = vmatprep.subr.mxu0 %v2336_v38 }
 0x66b   :  { %2653 = vmatpush3.msra.mxu0 %v2336_v38 }
 0x66c   :  { %2654 = vmatprep.subr.mxu0 %v2335_v20 }
 0x66d   :  { %2655 = vmatpush3.msra.mxu0 %v2335_v20 }
 0x66e   :  { %2656 = vmatprep.subr.mxu0 %v2334_v55 }
 0x66f   :  { %2657 = vmatpush3.msra.mxu0 %v2334_v55 }
 0x670   :  { %2658 = vmatprep.subr.mxu0 %v2333_v39 }
 0x671   :  { %2659 = vmatpush3.msra.mxu0 %v2333_v39 }
 0x672   :  { %2660 = vmatprep.subr.mxu0 %v2332_v23 }
 0x673   :  { %2661 = vmatpush3.msra.mxu0 %v2332_v23 }
 0x674   :  { %2662 = vmatprep.subr.mxu0 %v2331_v24 }
 0x675   :  { %2663 = vmatpush3.msra.mxu0 %v2331_v24 }
 0x676   :  { %2664 = vmatprep.subr.mxu0 %v2330_v41 }
 0x677   :  { %2665 = vmatpush3.msra.mxu0 %v2330_v41 }
 0x678   :  { %2666 = vmatprep.subr.mxu0 %v2329_v42 }
 0x679   :  { %2667 = vmatpush3.msra.mxu0 %v2329_v42 }
 0x67a   :  { %2668 = vmatprep.subr.mxu0 %v2328_v43 }
 0x67b   :  { %2669 = vmatpush3.msra.mxu0 %v2328_v43 }
 0x67c   :  { %2670 = vmatprep.subr.mxu0 %v2327_v11 }
 0x67d   :  { %2671 = vmatpush3.msra.mxu0 %v2327_v11 }
 0x67e   :  { %2672 = vmatprep.subr.mxu0 %v2326_v15 }
 0x67f   :  { %2673 = vmatpush3.msra.mxu0 %v2326_v15 }
 0x680   :  { %2674 = vmatprep.subr.mxu0 %v2325_v18 }
 0x681   :  { %2675 = vmatpush3.msra.mxu0 %v2325_v18 }
 0x682   :  { %2676 = vmatprep.subr.mxu0 %v2324_v51 }
 0x683   :  { %2677 = vmatpush3.msra.mxu0 %v2324_v51 }
 0x684   :  { %2678 = vmatprep.subr.mxu0 %v2323_v52 }
 0x685   :  { %2679 = vmatpush3.msra.mxu0 %v2323_v52 }
 0x726   :  { %v2636_v4 = vpop.f32.mrf.mxu0 }
 0x727   :  { %v2198_v5 = vadd.f32 %v2636_v4, %v2484_v3 }
 0x728   :  { %v2192_v6 = vpop.f32.mrf.mxu0 }
 0x729   :  { %v3173_v8 = vadd.f32 %v2735_v7, %v2198_v5  ;;  %v2193_v9 = vadd.f32 %v2484_v3, %v2192_v6 }
 0x72b   :  { %v3178_v34 = vadd.f32 %v2736_v10, %v2193_v9  ;;  %v2206_v33 = vsel %vm38_vm0, %v3173_v8, 0.0 }
 0x72c   :  { %2207 = vadd.xlane.f32.xlu1 %v2206_v33 }
 0x72d   :  { %v2203_v12 = vsel %vm38_vm0, %v3178_v34, 0.0 }
 0x72e   :  { %2204 = vadd.xlane.f32.xlu0 %v2203_v12 }
 0x7b5   :  { %v2208_v35 = vpop.xlane.xlu1 %2207 }
 0x7b6   :  { %v2210_v40 = vmul.f32 0.03125, %v2208_v35 }
 0x7b7   :  { %v2205_v17 = vpop.xlane.xlu0 %2204 }
 0x7b8   :  { %v2209_v47 = vmul.f32 0.03125, %v2205_v17  ;;  %v3185_v30 = vsub.f32 %v3173_v8, %v2210_v40 }
 0x7ba   :  { %v3188_v19 = vsub.f32 %v3178_v34, %v2209_v47  ;;  %v2214_v36 = vmul.f32 %v3185_v30, %v3185_v30 }
 0x7bc   :  { %v2213_v32 = vmul.f32 %v3188_v19, %v3188_v19  ;;  %v2218_v22 = vsel %vm38_vm0, %v2214_v36, 0.0 }
 0x7be   :  { %v2215_v21 = vsel %vm38_vm0, %v2213_v32, 0.0 }
 0x7bf   :  { %2216 = vadd.xlane.f32.xlu0 %v2215_v21 }
 0x7c3   :  { %2219 = vadd.xlane.f32.xlu0 %v2218_v22 }
 0x848   :  { %v2217_v44 = vpop.xlane.xlu0 %2216 }
 0x849   :  { %v2221_v45 = vmul.f32 0.03125, %v2217_v44 }
 0x84b   :  { %v2223_v49 = vadd.f32 1e-05, %v2221_v45 }
 0x84c   :  { %v2220_v16 = vpop.xlane.xlu0 %2219 }
 0x84d   :  { %2731 = vrsqrt.f32 %v2223_v49  ;;  %v2222_v46 = vmul.f32 0.03125, %v2220_v16 }
 0x84f   :  { %v2224_v13 = vadd.f32 1e-05, %v2222_v46 }
 0x851   :  { %2733 = vrsqrt.f32 %v2224_v13 }
 0x85a   :  { %v2732_v14 = vpop.eup %2731 }
 0x85b   :  { %v2227_v48 = vmul.f32 %v2732_v14, %v3188_v19 }
 0x85d   :  { %2645 = vmatprep.mubr.msk.f32.mxu1 %vm38_vm0, %v2227_v48 }
 0x85e   :  { %v2734_v50 = vpop.eup %2733 }
 0x85f   :  { %v2228_v26 = vmul.f32 %v2734_v50, %v3185_v30 }
 0x861   :  { %2646 = vmatmul.mubr.msk.f32.vlgmr.msra.gmra.mxu1 %vm38_vm0, %v2228_v26 }
 0x921   :  { %v2647_v54 = vpop.f32.mrf.mxu1 }
 0x922   :  { %v2318_v57 = vadd.f32 %v2647_v54, %v2487_v53 }
 0x923   :  { %v2312_v58 = vpop.f32.mrf.mxu1 }
 0x924   :  { %v2313_v59 = vadd.f32 %v2487_v53, %v2312_v58  ;;  %v2322_v56 = vmax.f32 %v2318_v57, 0.0 }
 0x926   :  { %v2321_v60 = vmax.f32 %v2313_v59, 0.0 }
 0x928   :  { %2680 = vmatprep.mubr.f32.mxu0 %v2321_v60 }
 0x929   :  { %2681 = vmatmul.mubr.f32.vlgmr.msra.gmra.mxu0 %v2322_v56 }
 0x9e9   :  { %v2682_v62 = vpop.f32.mrf.mxu0 }
 0x9ea   :  { %v2418_v63 = vadd.f32 %v2682_v62, %v2490_v61 }
 0x9eb   :  { %v2412_v0 = vpop.f32.mrf.mxu0 }
 0x9ec   :  { %v2422_v1 = vadd.f32 %v2418_v63, %v3173_v8  ;;  %v2413_v2 = vadd.f32 %v2490_v61, %v2412_v0 }
 0x9ee   :  { %2424 = vst.msk [vmem:[#allocation2 + $0x8] sm:$0xff] %vm38_vm0, %v2422_v1  ;;  %v2421_v3 = vadd.f32 %v2413_v2, %v3178_v34 }
 0x9f0   :  { %2423 = vst.msk [vmem:[#allocation2] sm:$0xff] %vm38_vm0, %v2421_v3 }
 0x9f1   :  { %2748 = shalt.err (!%p2745_p4)
}
 0x9f2   :  { %s2770_s9 = smov 128  }
 0x9f3   :  { %2436 = dma.vmem_to_hbm [thread:$0]  %s2431_s22, 256, %s3284_s10, [#allocation3], %s2770_s9, %s2770_s9, %s2766_s21  }
 0x9f4   :  { %2757 = dma.done.wait [#allocation3], 256  }
 0x9f5   :  { %2758 = vsyncadd [#allocation3], 4294967040 }
 0x9f6   :  { %2440 = vsyncpa [#allocation3], 1 }

</bundles_post_ra>
